<compile_context>
chip_gen: v5e
topology: v5e:2x2
jax: 0.10.0
libtpu: 0.0.40
codegen_flags: <defaults>
</compile_context>

<pallas_src>
import jax
import jax.numpy as jnp
from jax import lax
from jax.experimental import pallas as pl
from jax.experimental.pallas import tpu as pltpu


def _head_kernel(x_ref, w_ref, b_ref, o_ref):
    # x_ref: (TB, 1000) backbone features (one batch tile)
    # w_ref: (4, 1000)  == fc1.weight  (lane-major: K on lanes)
    # b_ref: (1, 4)     == fc1.bias
    x = jnp.maximum(x_ref[...], 0.0)                       # torch.relu
    # Contract K (last dim of both operands): (TB, K) x (N, K) -> (TB, N)
    y = lax.dot_general(
        x, w_ref[...],
        dimension_numbers=(((1,), (1,)), ((), ())),
        preferred_element_type=jnp.float32,
    )
    o_ref[...] = (y + b_ref[...]).astype(o_ref.dtype)      # nn.Linear(1000, 4)


def nn_head(features, w, bias, *, tb=1024):
    """features: (B, 1000), w: (4, 1000) [un-transposed fc1.weight], bias: (4,).

    Returns (B, 4) = relu(features) @ w.T + bias.
    """
    B, K = features.shape
    N = w.shape[0]
    # Batch tile: full array at small B (block==array exemption from (8,128)),
    # otherwise a multiple-of-8 tile sized for v7x's smaller VMEM.
    TB = B if B <= tb else tb
    grid = (pl.cdiv(B, TB),)
    bias2d = bias.reshape(1, N)

    cost = pl.CostEstimate(
        flops=2 * B * K * N,
        transcendentals=0,
        bytes_accessed=B * K * 4 + K * N * 4 + N * 4 + B * N * 4,
    )

    return pl.pallas_call(
        _head_kernel,
        out_shape=jax.ShapeDtypeStruct((B, N), features.dtype),
        grid_spec=pltpu.PrefetchScalarGridSpec(
            num_scalar_prefetch=0,
            grid=grid,
            in_specs=[
                pl.BlockSpec((TB, K), lambda i: (i, 0)),   # streamed batch tiles
                pl.BlockSpec((N, K), lambda i: (0, 0)),    # weight: VMEM-resident
                pl.BlockSpec((1, N), lambda i: (0, 0)),    # bias:   VMEM-resident
            ],
            out_specs=pl.BlockSpec((TB, N), lambda i: (i, 0)),
        ),
        compiler_params=pltpu.CompilerParams(
            dimension_semantics=("parallel",),  # batch tiles are independent
        ),
        cost_estimate=cost,
    )(features, w, bias2d)


def reference(features, w, bias):
    return jnp.maximum(features, 0.0) @ w.T + bias[None, :]


if __name__ == "__main__":
    key = jax.random.PRNGKey(0)
    k_feat, k_w, k_b, k_big = jax.random.split(key, 4)

    B, IN_FEATURES, OUT_FEATURES = 2, 1000, 4

    # Deterministic stand-in for the pretrained backbone's (B, 1000) output.
    features = jax.random.normal(k_feat, (B, IN_FEATURES), dtype=jnp.float32)

    # Deterministic fc1 parameters (nn.Linear(1000, 4)): weight (4, 1000), bias (4,)
    bound = 1.0 / jnp.sqrt(IN_FEATURES)
    w = jax.random.uniform(k_w, (OUT_FEATURES, IN_FEATURES),
                           minval=-bound, maxval=bound, dtype=jnp.float32)
    b = jax.random.uniform(k_b, (OUT_FEATURES,),
                           minval=-bound, maxval=bound, dtype=jnp.float32)

    # Small-batch case (block == full array).
    out = jax.block_until_ready(nn_head(features, w, b))
    ref = reference(features, w, b)
    assert out.shape == (B, OUT_FEATURES)
    assert jnp.allclose(out, ref, atol=1e-4, rtol=1e-4)

    # Exercise the tiled / pipelined path (grid > 1) with a larger batch.
    B_big = 2048
    features_big = jax.random.normal(k_big, (B_big, IN_FEATURES), dtype=jnp.float32)
    out_big = jax.block_until_ready(nn_head(features_big, w, b))
    ref_big = reference(features_big, w, b)
    assert out_big.shape == (B_big, OUT_FEATURES)
    assert jnp.allclose(out_big, ref_big, atol=1e-3, rtol=1e-3)

    print("KERNEL_OK")
</pallas_src>

<mosaic_0001>
module attributes {stable_mosaic.version = 11 : i64} {
  func.func @_head_kernel(%arg0: i32, %arg1: memref<2x1000xf32, #tpu.memory_space<vmem>>, %arg2: memref<4x1000xf32, #tpu.memory_space<vmem>>, %arg3: memref<1x4xf32, #tpu.memory_space<vmem>>, %arg4: memref<2x4xf32, #tpu.memory_space<vmem>>) attributes {dimension_semantics = [#tpu.dimension_semantics<parallel>], iteration_bounds = array<i64: 1>, scalar_prefetch = 0 : i64, scratch_operands = 0 : i64, tpu.core_type = #tpu.core_type<tc>, window_params = [{transform_indices = @transform_0, window_bounds = array<i64: 2, 1000>}, {pipeline_mode = #tpu.pipeline_mode<synchronous>, transform_indices = @transform_1, window_bounds = array<i64: 4, 1000>}, {pipeline_mode = #tpu.pipeline_mode<synchronous>, transform_indices = @transform_2, window_bounds = array<i64: 1, 4>}, {transform_indices = @transform_3, window_bounds = array<i64: 2, 4>}]} {
    %c0 = arith.constant 0 : index
    %c0_0 = arith.constant 0 : index
    %0 = vector.load %arg1[%c0, %c0_0] : memref<2x1000xf32, #tpu.memory_space<vmem>>, vector<2x1000xf32>
    %cst = arith.constant 0.000000e+00 : f32
    %1 = vector.broadcast %cst : f32 to vector<2x1000xf32>
    %2 = arith.maximumf %0, %1 : vector<2x1000xf32>
    %c0_1 = arith.constant 0 : index
    %c0_2 = arith.constant 0 : index
    %3 = vector.load %arg2[%c0_1, %c0_2] : memref<4x1000xf32, #tpu.memory_space<vmem>>, vector<4x1000xf32>
    %cst_3 = arith.constant dense<0.000000e+00> : vector<2x4xf32>
    %4 = tpu.matmul %2, %3, %cst_3 {dimension_numbers = #tpu.dot_dimension_numbers<[1], [1], [0], [0], [0, 0, 1, 0], [], []>} : vector<2x1000xf32>, vector<4x1000xf32>, vector<2x4xf32> -> vector<2x4xf32>
    %c0_4 = arith.constant 0 : index
    %c0_5 = arith.constant 0 : index
    %5 = vector.load %arg3[%c0_4, %c0_5] : memref<1x4xf32, #tpu.memory_space<vmem>>, vector<1x4xf32>
    %6 = vector.broadcast %5 : vector<1x4xf32> to vector<2x4xf32>
    %7 = arith.addf %4, %6 : vector<2x4xf32>
    %c0_6 = arith.constant 0 : index
    %c0_7 = arith.constant 0 : index
    %8 = vector.load %arg4[%c0_6, %c0_7] : memref<2x4xf32, #tpu.memory_space<vmem>>, vector<2x4xf32>
    tpu.vector_store %arg4[%c0_6, %c0_7], %7 {strides = array<i32>} : memref<2x4xf32, #tpu.memory_space<vmem>>, vector<2x4xf32>,
    return
  }
  func.func @transform_0(%arg0: i32) -> (i32, i32) {
    %c0_i32 = arith.constant 0 : i32
    %c0_i32_0 = arith.constant 0 : i32
    return %arg0, %c0_i32 : i32, i32
  }
  func.func @transform_1(%arg0: i32) -> (i32, i32) {
    %c0_i32 = arith.constant 0 : i32
    %c0_i32_0 = arith.constant 0 : i32
    %c0_i32_1 = arith.constant 0 : i32
    return %c0_i32, %c0_i32_0 : i32, i32
  }
  func.func @transform_2(%arg0: i32) -> (i32, i32) {
    %c0_i32 = arith.constant 0 : i32
    %c0_i32_0 = arith.constant 0 : i32
    %c0_i32_1 = arith.constant 0 : i32
    return %c0_i32, %c0_i32_0 : i32, i32
  }
  func.func @transform_3(%arg0: i32) -> (i32, i32) {
    %c0_i32 = arith.constant 0 : i32
    %c0_i32_0 = arith.constant 0 : i32
    return %arg0, %c0_i32 : i32, i32
  }
}

</mosaic_0001>

<bundles_post_ra>
// kernel: tpu_custom_call.1
= control target key start
LH: loop header
LB: loop body
LE: loop exit
PB: predicated region body
PF: predicated region fallthrough
CT: control target
= control target key end

     0   :  { %8 = vsyncpa [#allocation3], 0  ;;  %s407_s0 = inlined_call_operand.hbm [shape: f32[2,1000], index: 0, kind: input, shape index: {}]   ;;  %s408_s1 = inlined_call_operand.hbm [shape: f32[4,1000], index: 1, kind: input, shape index: {}]   ;;  %s409_s2 = inlined_call_operand.vmem [shape: f32[1,4], index: 2, kind: input, shape index: {}]   ;;  %s410_s3 = inlined_call_operand.hbm [shape: f32[2,4], index: 3, kind: output, shape index: {}]  }
   0x1   :  { %9 = vsyncpa [#allocation6], 0 }
   0x2   :  { %10 = vsyncpa [#allocation4], 0  ;;  %s16_s14 = sshll.u32 %s407_s0, 4  ;;  %s370_s15 = smov [#allocation2]   ;;  %s17_s14 = int_to_ptr.hbm [resolvable:$true] %s16_s14 }
   0x3   :  { %s18_s16 = sshll.u32 %s370_s15, 4  ;;  %s27_s19 = sshll.u32 %s408_s1, 4  ;;  %s19_s16 = int_to_ptr.vmem [resolvable:$true] %s18_s16  ;;  %s28_s19 = int_to_ptr.hbm [resolvable:$true] %s27_s19 }
   0x4   :  { %21 = dma.hbm_to_vmem [thread:$0]  %s17_s14, 256, %s19_s16, [#allocation3]  }
   0x5   :  { %s371_s20 = smov [#allocation5]  }
   0x6   :  { %s29_s21 = sshll.u32 %s371_s20, 4  ;;  %s30_s21 = int_to_ptr.vmem [resolvable:$true] %s29_s21 }
   0x7   :  { %32 = dma.hbm_to_vmem [thread:$0]  %s28_s19, 512, %s30_s21, [#allocation6]  }
   0x8   :  { %364 = dma.done.wait [#allocation3], 256  }
   0x9   :  { %365 = vsyncadd [#allocation3], 4294967040 }
   0xa   :  { %366 = dma.done.wait [#allocation6], 512  }
   0xb   :  { %367 = vsyncadd [#allocation6], 4294966784  ;;  %v43_v0 = vld [vmem:[#allocation2] sm:$0xff]  ;;  %v44_v2 = vld [vmem:[#allocation2 + $0x8] sm:$0xff]  ;;  %vm101_vm0 = vcmask 850944   ;;  %s372_s22 = smov [#allocation7]  }
   0xc   :  { %v45_v1 = vmax.f32 %v43_v0, 0.0  ;;  %v46_v3 = vmax.f32 %v44_v2, 0.0  ;;  %v48_v4 = vld [vmem:[#allocation5 + $0x8] sm:$0xff]  ;;  %v47_v5 = vld [vmem:[#allocation5] sm:$0xff]  ;;  %v50_v9 = vld [vmem:[#allocation5 + $0x18] sm:$0xff]  ;;  %s273_s23 = sshll.u32 %s372_s22, 4  ;;  %s274_s23 = int_to_ptr.vmem [resolvable:$true] %s273_s23 }
   0xd   :  { %v49_v13 = vld [vmem:[#allocation5 + $0x10] sm:$0xff]  ;;  %v291_v24 = vld [vmem:[%s409_s2] ss:$0 sm:$0xff]  ;;  %s275_s2 = sshll.u32 %s410_s3, 4  ;;  %vm266_vm1 = vcmask 25600   ;;  %s276_s2 = int_to_ptr.hbm [resolvable:$true] %s275_s2 }
   0xe   :  { %57 = vst [vmem:[#allocation1] ss:$4 sm:$0xff] %v45_v1 }
   0xf   :  { %59 = vst [vmem:[#allocation1 + $0x20] ss:$4 sm:$0xff] %v46_v3 }
  0x15   :  { %v62_v6 = vld.sshfl [vmem:[#allocation1 + $0x10] sm:$0xff pattern:$0x73625140]  ;;  %v63_v7 = vld.sshfl [vmem:[#allocation1 + $0x18] sm:$0xff pattern:$0x73625140] }
  0x16   :  { %81 = vst [vmem:[#allocation1 + $0x10] ss:$2 sm:$0xff] %v48_v4  ;;  %v60_v8 = vld.sshfl [vmem:[#allocation1] sm:$0xff pattern:$0x73625140] }
  0x17   :  { %v61_v10 = vld.sshfl [vmem:[#allocation1 + $0x8] sm:$0xff pattern:$0x73625140]  ;;  %v66_v11 = vld.sshfl [vmem:[#allocation1 + $0x30] sm:$0xff pattern:$0x73625140] }
  0x18   :  { %79 = vst [vmem:[#allocation1] ss:$2 sm:$0xff] %v47_v5  ;;  %v67_v12 = vld.sshfl [vmem:[#allocation1 + $0x38] sm:$0xff pattern:$0x73625140] }
  0x19   :  { %85 = vst [vmem:[#allocation1 + $0x30] ss:$2 sm:$0xff] %v50_v9  ;;  %v64_v14 = vld.sshfl [vmem:[#allocation1 + $0x20] sm:$0xff pattern:$0x73625140] }
  0x1a   :  { %v65_v15 = vld.sshfl [vmem:[#allocation1 + $0x28] sm:$0xff pattern:$0x73625140] }
  0x1b   :  { %83 = vst [vmem:[#allocation1 + $0x20] ss:$2 sm:$0xff] %v49_v13 }
  0x1d   :  { %v88_v16 = vld.sshfl [vmem:[#allocation1 + $0x10] sm:$0xff pattern:$0x75316420]  ;;  %v89_v17 = vld.sshfl [vmem:[#allocation1 + $0x18] sm:$0xff pattern:$0x75316420] }
  0x1e   :  { %161 = vmatpush.xpose.msra.mxu2 %v88_v16  ;;  %181 = vmatpush.xpose.msra.mxu3 %v89_v17 }
  0x1f   :  { %v86_v18 = vld.sshfl [vmem:[#allocation1] sm:$0xff pattern:$0x75316420]  ;;  %v87_v19 = vld.sshfl [vmem:[#allocation1 + $0x8] sm:$0xff pattern:$0x75316420] }
  0x20   :  { %121 = vmatpush.xpose.msra.mxu0 %v86_v18  ;;  %v92_v20 = vld.sshfl [vmem:[#allocation1 + $0x30] sm:$0xff pattern:$0x75316420]  ;;  %141 = vmatpush.xpose.msra.mxu1 %v87_v19  ;;  %v93_v21 = vld.sshfl [vmem:[#allocation1 + $0x38] sm:$0xff pattern:$0x75316420] }
  0x21   :  { %162 = vmatmul.f32.vlgmr.msra.gmra.mxu2 %v62_v6  ;;  %182 = vmatmul.f32.vlgmr.msra.gmra.mxu3 %v63_v7 }
  0x22   :  { %241 = vmatpush.xpose.msrb.mxu2 %v92_v20  ;;  %v90_v22 = vld.sshfl [vmem:[#allocation1 + $0x20] sm:$0xff pattern:$0x75316420]  ;;  %286 = vmatpush.xpose.msk.msrb.mxu3 %vm101_vm0, %v93_v21  ;;  %v91_v23 = vld.sshfl [vmem:[#allocation1 + $0x28] sm:$0xff pattern:$0x75316420] }
  0x23   :  { %122 = vmatmul.f32.vlgmr.msra.gmra.mxu0 %v60_v8  ;;  %142 = vmatmul.f32.vlgmr.msra.gmra.mxu1 %v61_v10 }
  0x24   :  { %201 = vmatpush.xpose.msrb.mxu0 %v90_v22  ;;  %221 = vmatpush.xpose.msrb.mxu1 %v91_v23 }
  0x29   :  { %242 = vmatmul.f32.vlgmr.msrb.gmra.mxu2 %v66_v11  ;;  %287 = vmatmul.msk.f32.vlgmr.msrb.gmra.mxu3 %vm101_vm0, %v67_v12 }
  0x2b   :  { %202 = vmatmul.f32.vlgmr.msrb.gmra.mxu0 %v64_v14  ;;  %222 = vmatmul.f32.vlgmr.msrb.gmra.mxu1 %v65_v15 }
  0xa0   :  { %v123_v25 = vpop.f32.mrf.mxu0  ;;  %v143_v26 = vpop.f32.mrf.mxu1 }
  0xa1   :  { %v124_v27 = vadd.f32 %v291_v24, %v123_v25 }
  0xa3   :  { %v144_v28 = vadd.f32 %v143_v26, %v124_v27 }
  0xa4   :  { %v163_v29 = vpop.f32.mrf.mxu2  ;;  %v183_v30 = vpop.f32.mrf.mxu3 }
  0xa5   :  { %v164_v31 = vadd.f32 %v163_v29, %v144_v28 }
  0xa7   :  { %v184_v32 = vadd.f32 %v183_v30, %v164_v31 }
  0xa8   :  { %v203_v33 = vpop.f32.mrf.mxu0  ;;  %v223_v34 = vpop.f32.mrf.mxu1 }
  0xa9   :  { %v204_v35 = vadd.f32 %v203_v33, %v184_v32 }
  0xab   :  { %v224_v36 = vadd.f32 %v223_v34, %v204_v35 }
  0xac   :  { %v243_v37 = vpop.f32.mrf.mxu2  ;;  %v263_v38 = vpop.f32.mrf.mxu3 }
  0xad   :  { %v244_v39 = vadd.f32 %v243_v37, %v224_v36 }
  0xaf   :  { %v264_v40 = vadd.f32 %v263_v38, %v244_v39 }
  0xb1   :  { %267 = vst.msk [vmem:[#allocation7] sm:$0x3] %vm266_vm1, %v264_v40 }
  0xb2   :  { %278 = dma.vmem_to_hbm [thread:$0]  %s274_s23, 32, %s276_s2, [#allocation4]  }
  0xb3   :  { %368 = dma.done.wait [#allocation4], 32  }
  0xb4   :  { %369 = vsyncadd [#allocation4], 4294967264 }
  0xb5   :  { %283 = vsyncpa [#allocation3], 1 }
  0xb6   :  { %284 = vsyncpa [#allocation6], 1 }
  0xb7   :  { %285 = vsyncpa [#allocation4], 1 }

</bundles_post_ra>
